<compile_context>
chip_gen: v7x
topology: tpu7x:2x2x1
jax: 0.10.0
libtpu: 0.0.40
codegen_flags: <defaults>
</compile_context>

<pallas_src>
import functools

import jax
import jax.numpy as jnp
from jax.experimental import pallas as pl
from jax.experimental.pallas import tpu as pltpu

_LANES = 512  # lane-dense width (multiple of 128)


def _bce_partial_kernel(p_ref, y_ref, partial_ref, *, rows, tile_rows, hard_labels):
    """Per-row-block partial BCE sum, written as a (1, 1, LANES) lane-dense row."""
    p = p_ref[...].astype(jnp.float32)
    y = y_ref[...].astype(jnp.float32)

    if hard_labels:
        # Labels are {0,1}: select first, ONE transcendental per element.
        q = jnp.where(y > 0.5, p, 1.0 - p)
        tile_loss = -jnp.maximum(jnp.log(q), -100.0)
    else:
        # Exact PyTorch semantics: clamp each log term at -100 before combining.
        log_p = jnp.maximum(jnp.log(p), -100.0)
        log_1mp = jnp.maximum(jnp.log1p(-p), -100.0)
        tile_loss = -(y * log_p + (1.0 - y) * log_1mp)

    lanes = tile_loss.shape[-1]
    partial_ref[...] = jnp.sum(tile_loss, axis=0, keepdims=True).reshape(1, 1, lanes)

    # Ragged last block: mask rows beyond `rows` (garbage reads) with a select
    # so NaNs never reach the sum.  Static check -> no code at all when tiling
    # is exact; pl.when -> only the final grid step pays for the mask.
    if rows % tile_rows != 0:
        i = pl.program_id(0)

        @pl.when(i == pl.num_programs(0) - 1)
        def _():
            row = i * tile_rows + jax.lax.broadcasted_iota(
                jnp.int32, (tile_rows, 1), 0
            )
            masked = jnp.where(row < rows, tile_loss, 0.0)
            partial_ref[...] = jnp.sum(masked, axis=0, keepdims=True).reshape(
                1, 1, lanes
            )


def classifier_loss(
    output,
    labels,
    *,
    target_block_bytes=4 * 1024 * 1024,
    vmem_budget_bytes=40 * 1024 * 1024,
    hard_labels=False,
):
    """Mean binary cross entropy between probabilities `output` and `labels`."""
    assert output.shape == labels.shape
    total = 1
    for d in output.shape:
        total *= int(d)
    assert total > 0

    out_isz = jnp.dtype(output.dtype).itemsize
    lab_isz = jnp.dtype(labels.dtype).itemsize
    itemsize = max(out_isz, lab_isz)

    # ---- Lane-dense flatten: (..,) -> (rows, _LANES) --------------------------
    rows = pl.cdiv(total, _LANES)
    padded = rows * _LANES
    p_flat = output.reshape(-1)
    y_flat = labels.reshape(-1)
    if padded != total:
        # (p=1, y=1) contributes exactly 0: y*log(1)=0, (1-y)*max(log(0),-100)=0.
        p_flat = jnp.pad(p_flat, (0, padded - total), constant_values=1.0)
        y_flat = jnp.pad(y_flat, (0, padded - total), constant_values=1.0)
    p2 = p_flat.reshape(rows, _LANES)
    y2 = y_flat.reshape(rows, _LANES)

    # ---- Tile sizing from actual itemsize + VMEM budget guard ----------------
    bytes_per_row_in = _LANES * itemsize                 # per input, per row
    tile_rows = max(8, (target_block_bytes // bytes_per_row_in) // 8 * 8)
    # Budget: 2 inputs x 2 pipeline buffers + ~3 f32 full-block temporaries.
    bytes_per_row_vmem = 4 * bytes_per_row_in + 3 * _LANES * 4
    budget_rows = max(8, (vmem_budget_bytes // bytes_per_row_vmem) // 8 * 8)
    tile_rows = min(tile_rows, budget_rows)
    if rows >= 32:
        # Keep >= 2 grid steps so DMA pipelining / v7x megacore split can help.
        tile_rows = min(tile_rows, max(8, (rows // 2) // 8 * 8))
    if tile_rows >= rows:
        tile_rows = rows  # single full-dim block (legal for any row count)
    num_blocks = pl.cdiv(rows, tile_rows)

    kernel = functools.partial(
        _bce_partial_kernel, rows=rows, tile_rows=tile_rows, hard_labels=hard_labels
    )

    cost = pl.CostEstimate(
        flops=6 * total,
        transcendentals=(1 if hard_labels else 2) * total,
        bytes_accessed=total * (out_isz + lab_isz) + num_blocks * _LANES * 4,
    )

    partials = pl.pallas_call(
        kernel,
        out_shape=jax.ShapeDtypeStruct((num_blocks, 1, _LANES), jnp.float32),
        grid_spec=pltpu.PrefetchScalarGridSpec(
            num_scalar_prefetch=0,
            grid=(num_blocks,),
            in_specs=[
                pl.BlockSpec((tile_rows, _LANES), lambda i: (i, 0)),
                pl.BlockSpec((tile_rows, _LANES), lambda i: (i, 0)),
            ],
            out_specs=pl.BlockSpec((1, 1, _LANES), lambda i: (i, 0, 0)),
        ),
        compiler_params=pltpu.CompilerParams(
            dimension_semantics=("parallel",),
            vmem_limit_bytes=48 * 1024 * 1024,
        ),
        cost_estimate=cost,
    )(p2, y2)

    # Tiny final reduction + mean scale in plain JAX (exact N*C denominator;
    # padded elements contribute exactly 0).
    return jnp.sum(partials) * (1.0 / float(total))


def _reference_bce(output, labels):
    p = output.astype(jnp.float32)
    y = labels.astype(jnp.float32)
    log_p = jnp.maximum(jnp.log(p), -100.0)
    log_1mp = jnp.maximum(jnp.log1p(-p), -100.0)
    return jnp.mean(-(y * log_p + (1.0 - y) * log_1mp))


if __name__ == "__main__":
    key = jax.random.PRNGKey(0)
    k1, k2, k3, k4, k5, k6 = jax.random.split(key, 6)

    # Case 1: small classifier with C not a multiple of 128 (exercises the
    # lane-dense flatten + zero-loss tail padding; single block).
    N1, C1 = 16, 100
    out1 = jax.nn.sigmoid(jax.random.normal(k1, (N1, C1), dtype=jnp.float32))
    lab1 = (jax.random.uniform(k2, (N1, C1)) > 0.5).astype(jnp.float32)
    loss1 = jax.block_until_ready(classifier_loss(out1, lab1))
    ref1 = _reference_bce(out1, lab1)
    assert jnp.allclose(loss1, ref1, rtol=1e-5, atol=1e-6), (loss1, ref1)

    # Case 2: forced tiny tile -> multiple blocks + ragged last row-block
    # (exercises the pl.when-gated tail mask).
    N2, C2 = 48, 205
    out2 = jax.nn.sigmoid(jax.random.normal(k3, (N2, C2), dtype=jnp.float32))
    lab2 = (jax.random.uniform(k4, (N2, C2)) > 0.5).astype(jnp.float32)
    loss2 = jax.block_until_ready(
        classifier_loss(out2, lab2, target_block_bytes=4096)
    )
    ref2 = _reference_bce(out2, lab2)
    assert jnp.allclose(loss2, ref2, rtol=1e-5, atol=1e-6), (loss2, ref2)

    # Case 3: bf16 inputs + hard-label single-log path (dtype-aware sizing,
    # EUP-relief variant).  Labels are hard {0,1}, so semantics match.
    N3, C3 = 32, 64
    out3 = jax.nn.sigmoid(jax.random.normal(k5, (N3, C3), dtype=jnp.float32)).astype(
        jnp.bfloat16
    )
    lab3 = (jax.random.uniform(k6, (N3, C3)) > 0.5).astype(jnp.bfloat16)
    loss3 = jax.block_until_ready(classifier_loss(out3, lab3, hard_labels=True))
    ref3 = _reference_bce(out3, lab3)
    assert jnp.allclose(loss3, ref3, rtol=5e-3, atol=1e-5), (loss3, ref3)

    print("KERNEL_OK")
</pallas_src>

<mosaic_0001>
module attributes {stable_mosaic.version = 11 : i64} {
  func.func @_bce_partial_kernel(%arg0: i32, %arg1: memref<4x512xf32, #tpu.memory_space<vmem>>, %arg2: memref<4x512xf32, #tpu.memory_space<vmem>>, %arg3: memref<1x1x512xf32, #tpu.memory_space<vmem>>) attributes {dimension_semantics = [#tpu.dimension_semantics<parallel>], iteration_bounds = array<i64: 1>, scalar_prefetch = 0 : i64, scratch_operands = 0 : i64, tpu.core_type = #tpu.core_type<tc>, window_params = [{transform_indices = @transform_0, window_bounds = array<i64: 4, 512>}, {transform_indices = @transform_1, window_bounds = array<i64: 4, 512>}, {transform_indices = @transform_2, window_bounds = array<i64: 1, 1, 512>}]} {
    %c0 = arith.constant 0 : index
    %c0_0 = arith.constant 0 : index
    %0 = vector.load %arg1[%c0, %c0_0] : memref<4x512xf32, #tpu.memory_space<vmem>>, vector<4x512xf32>
    %c0_1 = arith.constant 0 : index
    %c0_2 = arith.constant 0 : index
    %1 = vector.load %arg2[%c0_1, %c0_2] : memref<4x512xf32, #tpu.memory_space<vmem>>, vector<4x512xf32>
    %2 = math.log %0 : vector<4x512xf32>
    %cst = arith.constant -1.000000e+02 : f32
    %3 = vector.broadcast %cst : f32 to vector<4x512xf32>
    %4 = arith.maximumf %2, %3 : vector<4x512xf32>
    %cst_3 = arith.constant 0.000000e+00 : f32
    %5 = vector.broadcast %cst_3 : f32 to vector<4x512xf32>
    %6 = arith.subf %5, %0 : vector<4x512xf32>
    %7 = math.log1p %6 : vector<4x512xf32>
    %cst_4 = arith.constant -1.000000e+02 : f32
    %8 = vector.broadcast %cst_4 : f32 to vector<4x512xf32>
    %9 = arith.maximumf %7, %8 : vector<4x512xf32>
    %10 = arith.mulf %1, %4 : vector<4x512xf32>
    %cst_5 = arith.constant 1.000000e+00 : f32
    %11 = vector.broadcast %cst_5 : f32 to vector<4x512xf32>
    %12 = arith.subf %11, %1 : vector<4x512xf32>
    %13 = arith.mulf %12, %9 : vector<4x512xf32>
    %14 = arith.addf %10, %13 : vector<4x512xf32>
    %cst_6 = arith.constant 0.000000e+00 : f32
    %15 = vector.broadcast %cst_6 : f32 to vector<4x512xf32>
    %16 = arith.subf %15, %14 : vector<4x512xf32>
    %cst_7 = arith.constant dense<0.000000e+00> : vector<512xf32>
    %17 = vector.multi_reduction <add>, %16, %cst_7 [0] : vector<4x512xf32> to vector<512xf32>
    %18 = vector.shape_cast %17 : vector<512xf32> to vector<1x512xf32>
    %19 = vector.shape_cast %18 : vector<1x512xf32> to vector<1x1x512xf32>
    %c0_8 = arith.constant 0 : index
    %c0_9 = arith.constant 0 : index
    %c0_10 = arith.constant 0 : index
    %20 = vector.load %arg3[%c0_8, %c0_9, %c0_10] : memref<1x1x512xf32, #tpu.memory_space<vmem>>, vector<1x1x512xf32>
    tpu.vector_store %arg3[%c0_8, %c0_9, %c0_10], %19 {strides = array<i32>} : memref<1x1x512xf32, #tpu.memory_space<vmem>>, vector<1x1x512xf32>,
    return
  }
  func.func @transform_0(%arg0: i32) -> (i32, i32) {
    %c0_i32 = arith.constant 0 : i32
    %c0_i32_0 = arith.constant 0 : i32
    return %arg0, %c0_i32 : i32, i32
  }
  func.func @transform_1(%arg0: i32) -> (i32, i32) {
    %c0_i32 = arith.constant 0 : i32
    %c0_i32_0 = arith.constant 0 : i32
    return %arg0, %c0_i32 : i32, i32
  }
  func.func @transform_2(%arg0: i32) -> (i32, i32, i32) {
    %c0_i32 = arith.constant 0 : i32
    %c0_i32_0 = arith.constant 0 : i32
    %c0_i32_1 = arith.constant 0 : i32
    return %arg0, %c0_i32, %c0_i32_0 : i32, i32, i32
  }
}

</mosaic_0001>

<bundles_post_ra>
// kernel: tpu_custom_call.1
= control target key start
LH: loop header
LB: loop body
LE: loop exit
PB: predicated region body
PF: predicated region fallthrough
CT: control target
= control target key end

     0   :  { %7 = vsyncpa [#allocation3], 0  ;;  %s302_s0 = inlined_call_operand.hbm [shape: f32[4,512], index: 0, kind: input, shape index: {}]   ;;  %s303_s1 = inlined_call_operand.hbm [shape: f32[4,512], index: 1, kind: input, shape index: {}]   ;;  %s304_s2 = inlined_call_operand.hbm [shape: f32[1,1,512], index: 2, kind: output, shape index: {}]  }
   0x1   :  { %8 = vsyncpa [#allocation6], 0 }
   0x2   :  { %9 = vsyncpa [#allocation4], 0  ;;  %s247_s9 = smov [#allocation2]   ;;  %s248_s11 = smov [#allocation5]  }
   0x3   :  { %s16_s10 = sshll.u32 %s247_s9, 4  ;;  %s26_s12 = sshll.u32 %s248_s11, 4  ;;  %s17_s10 = int_to_ptr.vmem [resolvable:$true] %s16_s10  ;;  %s27_s12 = int_to_ptr.vmem [resolvable:$true] %s26_s12 }
   0x4   :  { %s175_s15 = scalar_lea.hbm %s302_s0, 256 }
   0x5   :  { %p176_p0 = scmp.ne.s32.totalorder %s302_s0, %s175_s15  ;;  %p179_p1 = scmp.lt.u32.totalorder %s175_s15, %s302_s0 }
   0x7   :  { %p181_p2 = pnand %p179_p1, %p176_p0 }
   0x9   :  { %184 = shalt.err (!%p181_p2)
}
   0xa   :  { %s185_s20 = scalar_lea.vmem %s17_s10, 256  ;;  %p190_p4 = scmp.lt.s32.totalorder %s17_s10, %s17_s10 }
   0xb   :  { %p186_p3 = scmp.ne.s32.totalorder %s17_s10, %s185_s20  ;;  %p191_p5 = scmp.lt.s32.totalorder %s185_s20, %s185_s20 }
   0xd   :  { %p192_p6 = por %p191_p5, %p190_p4 }
   0xf   :  { %p193_p7 = pnand %p192_p6, %p186_p3 }
  0x11   :  { %196 = shalt.err (!%p193_p7)
}
  0x12   :  { %19 = dma.hbm_to_vmem [thread:$0]  %s302_s0, 256, %s17_s10, [#allocation3]  }
  0x13   :  { %s197_s25 = scalar_lea.hbm %s303_s1, 256 }
  0x14   :  { %p198_p8 = scmp.ne.s32.totalorder %s303_s1, %s197_s25  ;;  %p201_p9 = scmp.lt.u32.totalorder %s197_s25, %s303_s1 }
  0x16   :  { %p203_p10 = pnand %p201_p9, %p198_p8 }
  0x18   :  { %206 = shalt.err (!%p203_p10)
}
  0x19   :  { %s207_s30 = scalar_lea.vmem %s27_s12, 256  ;;  %p212_p12 = scmp.lt.s32.totalorder %s27_s12, %s27_s12 }
  0x1a   :  { %p208_p11 = scmp.ne.s32.totalorder %s27_s12, %s207_s30  ;;  %p213_p13 = scmp.lt.s32.totalorder %s207_s30, %s207_s30 }
  0x1c   :  { %p214_p0 = por %p213_p13, %p212_p12 }
  0x1e   :  { %p215_p1 = pnand %p214_p0, %p208_p11 }
  0x20   :  { %218 = shalt.err (!%p215_p1)
}
  0x21   :  { %29 = dma.hbm_to_vmem [thread:$0]  %s303_s1, 256, %s27_s12, [#allocation6]  }
  0x22   :  { %241 = dma.done.wait [#allocation3], 256  }
  0x23   :  { %242 = vsyncadd [#allocation3], 4294967040 }
  0x24   :  { %243 = dma.done.wait [#allocation6], 256  }
  0x25   :  { %244 = vsyncadd [#allocation6], 4294967040  ;;  %v36_v0 = vld [vmem:[#allocation2] sm:$0xff]  ;;  %v37_v1 = vld [vmem:[#allocation2 + $0x8] sm:$0xff]  ;;  %vm84_vm2 = vcmask 1043456   ;;  %v122_v56 = vlaneseq  ;;  %s250_s1 = smov [#allocation7]  }
  0x26   :  { %167 = vlog2.f32 %v36_v0  ;;  %v46_v2 = vsub.f32 0.0, %v36_v0  ;;  %v47_v3 = vsub.f32 0.0, %v37_v1  ;;  %v38_v16 = vld [vmem:[#allocation5] sm:$0xff]  ;;  %v39_v19 = vld [vmem:[#allocation5 + $0x8] sm:$0xff]  ;;  %v249_v54 = vmov 1966171168  }
  0x27   :  { %169 = vlog2.f32 %v37_v1  ;;  %v70_v26 = vsub.f32 1.0, %v38_v16  ;;  %v71_v28 = vsub.f32 1.0, %v39_v19  ;;  %v120_v55 = vunpack.c.l.s4 %v249_v54  ;;  %s153_s4 = sshll.u32 %s250_s1, 4  ;;  %s154_s4 = int_to_ptr.vmem [resolvable:$true] %s153_s4 }
  0x28   :  { %v48_v4 = vadd.f32 1.0, %v46_v2  ;;  %v57_v5 = vadd.f32 1.0, %v47_v3  ;;  %v51_v6 = vmul.f32 -0.5, %v46_v2  ;;  %v60_v7 = vmul.f32 -0.5, %v47_v3  ;;  %s219_s5 = scalar_lea.vmem %s154_s4, 64  ;;  %p224_p3 = scmp.lt.s32.totalorder %s154_s4, %s154_s4 }
  0x29   :  { %v54_v10 = vand.u32 2147483647, %v46_v2  ;;  %v63_v14 = vand.u32 2147483647, %v47_v3  ;;  %v121_v1 = vunpack.c.0.s8 %v120_v55  ;;  %vm144_vm3 = vcmp.lt.s32.totalorder %v122_v56, 512  ;;  %p220_p2 = scmp.ne.s32.totalorder %s154_s4, %s219_s5  ;;  %p225_p4 = scmp.lt.s32.totalorder %s219_s5, %s219_s5 }
  0x2a   :  { %171 = vlog2.f32 %v48_v4  ;;  %v52_v8 = vadd.f32 1.0, %v51_v6  ;;  %v61_v11 = vadd.f32 1.0, %v60_v7 }
  0x2b   :  { %173 = vlog2.f32 %v57_v5  ;;  %vm55_vm0 = vcmp.lt.f32.partialorder %v54_v10, 0.0004427343  ;;  %vm64_vm1 = vcmp.lt.f32.partialorder %v63_v14, 0.0004427343  ;;  %p226_p5 = por %p225_p4, %p224_p3 }
  0x2c   :  { %v53_v17 = vmul.f32 %v52_v8, %v46_v2  ;;  %v62_v21 = vmul.f32 %v61_v11, %v47_v3  ;;  %v123_v2 = vshrl.u32 %v122_v56, 7 }
  0x2d   :  { %p227_p6 = pnand %p226_p5, %p220_p2 }
  0x2e   :  { %v124_v10 = vsub.s32 %v121_v1, %v123_v2 }
  0x30   :  { %v168_v9 = vpop.eup %167 }
  0x31   :  { %v170_v12 = vpop.eup %169  ;;  %v41_v13 = vmul.f32 0.6931472, %v168_v9 }
  0x32   :  { %v43_v15 = vmul.f32 0.6931472, %v170_v12 }
  0x33   :  { %v44_v20 = vmax.f32 %v41_v13, -100.0 }
  0x34   :  { %v172_v18 = vpop.eup %171  ;;  %v45_v23 = vmax.f32 %v43_v15, -100.0 }
  0x35   :  { %v174_v22 = vpop.eup %173  ;;  %v50_v24 = vmul.f32 0.6931472, %v172_v18  ;;  %v68_v31 = vmul.f32 %v44_v20, %v38_v16 }
  0x36   :  { %v59_v25 = vmul.f32 0.6931472, %v174_v22  ;;  %v69_v33 = vmul.f32 %v45_v23, %v39_v19 }
  0x37   :  { %v56_v27 = vsel %vm55_vm0, %v53_v17, %v50_v24 }
  0x38   :  { %v65_v29 = vsel %vm64_vm1, %v62_v21, %v59_v25  ;;  %v66_v30 = vmax.f32 %v56_v27, -100.0 }
  0x39   :  { %v67_v32 = vmax.f32 %v65_v29, -100.0 }
  0x3a   :  { %v72_v34 = vmul.f32 %v70_v26, %v66_v30 }
  0x3b   :  { %v73_v35 = vmul.f32 %v71_v28, %v67_v32 }
  0x3c   :  { %v74_v36 = vadd.f32 %v72_v34, %v68_v31 }
  0x3d   :  { %v75_v37 = vadd.f32 %v73_v35, %v69_v33 }
  0x3e   :  { %v76_v38 = vsub.f32 0.0, %v74_v36 }
  0x3f   :  { %v77_v39 = vsub.f32 0.0, %v75_v37 }
  0x40   :  { %v80_v40 = vcombine.high %v76_v38, %v76_v38  ;;  %v85_v41 = vsel %vm84_vm2, %v76_v38, 0.0 }
  0x41   :  { %v81_v42 = vcombine.high %v77_v39, %v77_v39  ;;  %v86_v43 = vrot.slane %v85_v41, 4  ;;  %v99_v44 = vsel %vm84_vm2, %v77_v39, 0.0 }
  0x42   :  { %v92_v45 = vsel %vm84_vm2, %v80_v40, 0.0  ;;  %v100_v46 = vrot.slane %v99_v44, 4 }
  0x43   :  { %v87_v47 = vadd.f32 %v86_v43, %v85_v41  ;;  %v93_v48 = vrot.slane %v92_v45, 4  ;;  %v106_v49 = vsel %vm84_vm2, %v81_v42, 0.0 }
  0x44   :  { %v101_v50 = vadd.f32 %v100_v46, %v99_v44  ;;  %v107_v51 = vrot.slane %v106_v49, 4 }
  0x45   :  { %v88_v52 = vrot.slane %v87_v47, 2  ;;  %v94_v53 = vadd.f32 %v93_v48, %v92_v45 }
  0x46   :  { %v102_v57 = vrot.slane %v101_v50, 2  ;;  %v108_v58 = vadd.f32 %v107_v51, %v106_v49 }
  0x47   :  { %v89_v59 = vadd.f32 %v88_v52, %v87_v47  ;;  %v95_v60 = vrot.slane %v94_v53, 2 }
  0x48   :  { %v103_v61 = vadd.f32 %v102_v57, %v101_v50  ;;  %v109_v62 = vrot.slane %v108_v58, 2 }
  0x49   :  { %v90_v63 = vrot.slane %v89_v59, 1  ;;  %v96_v0 = vadd.f32 %v95_v60, %v94_v53 }
  0x4a   :  { %v104_v3 = vrot.slane %v103_v61, 1  ;;  %v110_v4 = vadd.f32 %v109_v62, %v108_v58 }
  0x4b   :  { %v91_v5 = vadd.f32 %v90_v63, %v89_v59  ;;  %v97_v6 = vrot.slane %v96_v0, 1 }
  0x4c   :  { %v105_v7 = vadd.f32 %v104_v3, %v103_v61  ;;  %v111_v8 = vrot.slane %v110_v4, 1 }
  0x4d   :  { %v98_v9 = vadd.f32 %v97_v6, %v96_v0 }
  0x4e   :  { %v112_v11 = vadd.f32 %v111_v8, %v110_v4 }
  0x4f   :  { %v117_v12 = vcombine.low %v91_v5, %v98_v9 }
  0x50   :  { %v118_v13 = vcombine.low %v105_v7, %v112_v11 }
  0x51   :  { %v125_v14 = vrot.slane %v117_v12, %v124_v10 }
  0x52   :  { %v132_v15 = vrot.slane %v118_v13, %v124_v10 }
  0x54   :  { %v133_v16 = vcombine.low %v125_v14, %v132_v15 }
  0x56   :  { %v140_v17 = vrot.slane %v133_v16, %v124_v10 }
  0x58   :  { %146 = vst.msk [vmem:[#allocation7] sm:$0xf] %vm144_vm3, %v140_v17 }
  0x59   :  { %230 = shalt.err (!%p227_p6)
}
  0x5a   :  { %s231_s8 = scalar_lea.hbm %s304_s2, 64 }
  0x5b   :  { %p232_p7 = scmp.ne.s32.totalorder %s304_s2, %s231_s8  ;;  %p235_p8 = scmp.lt.u32.totalorder %s231_s8, %s304_s2 }
  0x5d   :  { %p237_p9 = pnand %p235_p8, %p232_p7 }
  0x5f   :  { %240 = shalt.err (!%p237_p9)
}
  0x60   :  { %156 = dma.vmem_to_hbm [thread:$0]  %s154_s4, 64, %s304_s2, [#allocation4]  }
  0x61   :  { %245 = dma.done.wait [#allocation4], 64  }
  0x62   :  { %246 = vsyncadd [#allocation4], 4294967232 }
  0x63   :  { %160 = vsyncpa [#allocation3], 1 }
  0x64   :  { %161 = vsyncpa [#allocation6], 1 }
  0x65   :  { %162 = vsyncpa [#allocation4], 1 }

</bundles_post_ra>
